<compile_context>
chip_gen: v6e
topology: v6e:2x2x1
jax: 0.10.0
libtpu: 0.0.40
codegen_flags: <defaults>
</compile_context>

<pallas_src>
import functools

import jax
import jax.numpy as jnp
from jax.experimental import pallas as pl
from jax.experimental.pallas import tpu as pltpu


def _round_up(a: int, b: int) -> int:
    return ((a + b - 1) // b) * b


# --------------------------- device configuration -------------------------- #
def _device_config(d_model: int):
    """Per-TPU-generation (pack, max_rows_per_tile, vmem_limit_bytes)."""
    def pick_pack(target_n: int) -> int:
        if d_model <= target_n and target_n % d_model == 0:
            return target_n // d_model
        if d_model < 128 and 128 % d_model == 0:
            return 128 // d_model
        return 1

    kind = ""
    try:
        dev = jax.devices()[0]
        if dev.platform == "tpu":
            kind = dev.device_kind.lower()
    except Exception:  # defensive: fall through to conservative defaults
        pass

    if "v7" in kind:
        # v7x: 2x256 MXU, 3.2 TB/s HBM, 64 MiB VMEM/TC (32 MiB scoped default).
        # Large row tiles amortize the ~0.35us/step overhead; raise scoped VMEM.
        return pick_pack(256), 8192, 48 << 20
    if "v6" in kind:
        # v6e: 2x256 MXU, 128 MiB VMEM (32 MiB scoped default).
        return pick_pack(256), 8192, 48 << 20
    if "v5 lite" in kind or "v5lite" in kind or "v5e" in kind:
        # v5e: 128-wide MXU tiles; stay inside the 16 MiB scoped-VMEM default.
        return pick_pack(128), 3072, None
    # Unknown generation: conservative defaults (known-good on all chips).
    return pick_pack(128), 2048, None


# ----------------------------- Pallas kernel ------------------------------ #
def _projection_kernel(x_ref, w_ref, b_ref, o_ref):
    # x_ref : (TM, pack*P)      packed patch rows
    # w_ref : (pack*P, pack*D)  block-diagonal projection weight (resident)
    # b_ref : (1, pack*D)       tiled bias (resident)
    # o_ref : (TM, pack*D)      lane-dense output tile
    acc = jnp.dot(x_ref[...], w_ref[...], preferred_element_type=jnp.float32)
    o_ref[...] = (acc + b_ref[...]).astype(o_ref.dtype)


def _projection_pallas(x2d, w_big, b_big, *, pack, max_rows_per_tile,
                       vmem_limit_bytes):
    """out = x2d @ W_perm.T + b, as a lane-dense, M-tiled Pallas matmul."""
    m, pfeat = x2d.shape
    dk = b_big.shape[-1]                  # pack * d_model
    d = dk // pack
    pk = pack * pfeat                     # packed K

    m_pad = _round_up(m, pack)
    if m_pad != m:
        x2d = jnp.pad(x2d, ((0, m_pad - m), (0, 0)))
    rows = m_pad // pack
    x_big = x2d.reshape(rows, pk)         # free row-major reshape

    # Row tile: as big as the per-generation budget allows, but split into
    # >=2 grid steps whenever possible so both v7x TensorCores get work.
    tile_rows = min(max_rows_per_tile, _round_up(rows, 8))
    if rows > 8:
        two_way = max(8, _round_up(-(-rows // 2), 8))
        tile_rows = min(tile_rows, two_way)
    tile_rows = max(8, _round_up(tile_rows, 8))
    grid = (pl.cdiv(rows, tile_rows),)

    itemsize = x2d.dtype.itemsize
    cost = pl.CostEstimate(
        flops=2 * m * pfeat * d,          # useful flops (not block-diag inflated)
        transcendentals=0,
        bytes_accessed=(rows * (pk + dk) + pk * dk + dk) * itemsize,
    )

    cp_kwargs = dict(dimension_semantics=("parallel",))
    if vmem_limit_bytes is not None:
        cp_kwargs["vmem_limit_bytes"] = int(vmem_limit_bytes)

    out_big = pl.pallas_call(
        _projection_kernel,
        out_shape=jax.ShapeDtypeStruct((rows, dk), x2d.dtype),
        grid_spec=pl.GridSpec(
            grid=grid,
            in_specs=[
                pl.BlockSpec((tile_rows, pk), lambda i: (i, 0)),
                pl.BlockSpec((pk, dk), lambda i: (0, 0)),   # resident weight
                pl.BlockSpec((1, dk), lambda i: (0, 0)),    # resident bias
            ],
            out_specs=pl.BlockSpec((tile_rows, dk), lambda i: (i, 0)),
        ),
        compiler_params=pltpu.CompilerParams(**cp_kwargs),
        cost_estimate=cost,
    )(x_big, w_big, b_big)

    out = out_big.reshape(m_pad, d)       # free row-major reshape
    return out[:m]


# ---------------------------- Jitted forward ------------------------------- #
@functools.partial(
    jax.jit,
    static_argnames=("patch_size", "pack", "max_rows_per_tile",
                     "vmem_limit_bytes", "use_pallas"))
def _patchify_forward(x, w_big, b_big, *, patch_size, pack, max_rows_per_tile,
                      vmem_limit_bytes, use_pallas):
    b, c, h, w = x.shape
    p = patch_size
    # Matches torch F.pad(x, (W%p, 0, H%p, 0)): left pad on width, top pad on
    # height (faithfully mirrors the reference's padding quirk).
    x = jnp.pad(x, ((0, 0), (0, 0), (h % p, 0), (w % p, 0)))
    hp, wp = x.shape[-2], x.shape[-1]
    nh, nw = hp // p, wp // p
    # Patch rearrange with feature order (c, ph, pw): the innermost pw run
    # stays contiguous, so XLA's transpose copies contiguous p-element runs
    # instead of scattering single elements. The weight's input dim was
    # permuted once at init to match, so the result equals the reference's
    # (ph, pw, c) ordering exactly.
    # TODO(synk): fuse this pad+rearrange into the Pallas kernel (BlockSpec
    # row-strips over the NCHW tensor) to cut the remaining HBM round-trip.
    x = x.reshape(b, c, nh, p, nw, p)
    x = jnp.transpose(x, (0, 2, 4, 1, 3, 5))          # (b, nh, nw, c, ph, pw)
    pfeat = c * p * p
    m = b * nh * nw
    x2d = x.reshape(m, pfeat)                         # (M, P)

    d = b_big.shape[-1] // pack
    if use_pallas:
        out2d = _projection_pallas(
            x2d, w_big, b_big, pack=pack,
            max_rows_per_tile=max_rows_per_tile,
            vmem_limit_bytes=vmem_limit_bytes)
    else:
        # Small-M fallback: pallas_call fixed launch/pipeline overhead exceeds
        # the work; XLA's fused dot is faster. Slice the plain weight/bias out
        # of the precomputed packed versions (block 0 of the kron).
        out2d = x2d @ w_big[:pfeat, :d] + b_big[0, :d]
    return out2d.reshape(b, nh * nw, d)


# ------------------------------- Module ----------------------------------- #
class Patchify:
    def __init__(self, *, patch_size: int = 4, d_model: int = 32,
                 num_channels: int = 3, key=None,
                 min_pallas_patches: int = 4096) -> None:
        self.num_channels = num_channels
        self.patch_size = patch_size
        self.d_model = d_model
        self.min_pallas_patches = min_pallas_patches
        in_features = patch_size ** 2 * num_channels
        if key is None:
            key = jax.random.PRNGKey(0)
        k_w, k_b = jax.random.split(key)
        # Deterministic init mimicking nn.Linear's uniform(-1/sqrt(fan_in), .)
        bound = 1.0 / (in_features ** 0.5)
        # torch layout: weight (out, in), input features ordered (ph, pw, c).
        self.weight = jax.random.uniform(
            k_w, (d_model, in_features), jnp.float32, -bound, bound)
        self.bias = jax.random.uniform(
            k_b, (d_model,), jnp.float32, -bound, bound)

        # ---- one-time precompute (per perf review) ----
        p, cch, dm = patch_size, num_channels, d_model
        # Column permutation mapping new feature order (c, ph, pw) -> original
        # (ph, pw, c) positions of the torch weight.
        perm = jnp.asarray(
            [ph * p * cch + pw * cch + ch
             for ch in range(cch) for ph in range(p) for pw in range(p)],
            dtype=jnp.int32)
        weight_t_perm = self.weight[:, perm].T            # (P, D)
        self.pack, self.max_rows_per_tile, self.vmem_limit_bytes = (
            _device_config(dm))
        # Block-diagonal packed weight / tiled bias, built once at init.
        self.w_big = jnp.kron(
            jnp.eye(self.pack, dtype=weight_t_perm.dtype), weight_t_perm)
        self.b_big = jnp.tile(self.bias, self.pack).reshape(1, self.pack * dm)

    def __call__(self, x):
        b, _, h, w = x.shape
        p = self.patch_size
        hp, wp = h + h % p, w + w % p
        m = b * (hp // p) * (wp // p)
        use_pallas = m >= self.min_pallas_patches
        return _patchify_forward(
            x, self.w_big, self.b_big,
            patch_size=p, pack=self.pack,
            max_rows_per_tile=self.max_rows_per_tile,
            vmem_limit_bytes=self.vmem_limit_bytes,
            use_pallas=use_pallas)


# -------------------------------- Main ------------------------------------ #
if __name__ == "__main__":
    key = jax.random.PRNGKey(0)
    k_in, k_params = jax.random.split(key)

    B, C, H, W = 2, 3, 32, 32          # -> 128 patches: >= 2 parallel grid steps
    x = jax.random.normal(k_in, (B, C, H, W), jnp.float32)

    # min_pallas_patches=0 forces the Pallas path for this small demo.
    model = Patchify(patch_size=4, d_model=32, num_channels=3, key=k_params,
                     min_pallas_patches=0)
    out = jax.block_until_ready(model(x))

    # Reference: plain-JAX equivalent of the torch module, using the ORIGINAL
    # (ph, pw, c) feature order + original weight — validates the permuted,
    # packed, block-diagonal weights used by the kernel.
    p = model.patch_size
    xr = jnp.pad(x, ((0, 0), (0, 0), (H % p, 0), (W % p, 0)))
    nh, nw = xr.shape[-2] // p, xr.shape[-1] // p
    xr = xr.reshape(B, C, nh, p, nw, p)
    xr = jnp.transpose(xr, (0, 2, 4, 3, 5, 1)).reshape(B, nh * nw, p * p * C)
    ref = xr @ model.weight.T + model.bias

    assert out.shape == (B, nh * nw, model.d_model)
    assert jnp.allclose(out, ref, atol=1e-5, rtol=1e-5)
    print("KERNEL_OK")
</pallas_src>

<mosaic_0001>
module attributes {stable_mosaic.version = 11 : i64} {
  func.func @_projection_kernel(%arg0: i32, %arg1: memref<16x192xf32, #tpu.memory_space<vmem>>, %arg2: memref<192x128xf32, #tpu.memory_space<vmem>>, %arg3: memref<1x128xf32, #tpu.memory_space<vmem>>, %arg4: memref<16x128xf32, #tpu.memory_space<vmem>>) attributes {dimension_semantics = [#tpu.dimension_semantics<parallel>], iteration_bounds = array<i64: 2>, scalar_prefetch = 0 : i64, scratch_operands = 0 : i64, tpu.core_type = #tpu.core_type<tc>, window_params = [{transform_indices = @transform_0, window_bounds = array<i64: 16, 192>}, {pipeline_mode = #tpu.pipeline_mode<synchronous>, transform_indices = @transform_1, window_bounds = array<i64: 192, 128>}, {pipeline_mode = #tpu.pipeline_mode<synchronous>, transform_indices = @transform_2, window_bounds = array<i64: 1, 128>}, {transform_indices = @transform_3, window_bounds = array<i64: 16, 128>}]} {
    %c0 = arith.constant 0 : index
    %c0_0 = arith.constant 0 : index
    %0 = vector.load %arg1[%c0, %c0_0] : memref<16x192xf32, #tpu.memory_space<vmem>>, vector<16x192xf32>
    %c0_1 = arith.constant 0 : index
    %c0_2 = arith.constant 0 : index
    %1 = vector.load %arg2[%c0_1, %c0_2] : memref<192x128xf32, #tpu.memory_space<vmem>>, vector<192x128xf32>
    %cst = arith.constant dense<0.000000e+00> : vector<16x128xf32>
    %2 = tpu.matmul %0, %1, %cst {dimension_numbers = #tpu.dot_dimension_numbers<[1], [0], [0], [1], [0, 0, 1, 1], [], []>} : vector<16x192xf32>, vector<192x128xf32>, vector<16x128xf32> -> vector<16x128xf32>
    %c0_3 = arith.constant 0 : index
    %c0_4 = arith.constant 0 : index
    %3 = vector.load %arg3[%c0_3, %c0_4] : memref<1x128xf32, #tpu.memory_space<vmem>>, vector<1x128xf32>
    %4 = vector.broadcast %3 : vector<1x128xf32> to vector<16x128xf32>
    %5 = arith.addf %2, %4 : vector<16x128xf32>
    %c0_5 = arith.constant 0 : index
    %c0_6 = arith.constant 0 : index
    %6 = vector.load %arg4[%c0_5, %c0_6] : memref<16x128xf32, #tpu.memory_space<vmem>>, vector<16x128xf32>
    tpu.vector_store %arg4[%c0_5, %c0_6], %5 {strides = array<i32>} : memref<16x128xf32, #tpu.memory_space<vmem>>, vector<16x128xf32>,
    return
  }
  func.func @transform_0(%arg0: i32) -> (i32, i32) {
    %c0_i32 = arith.constant 0 : i32
    %c0_i32_0 = arith.constant 0 : i32
    return %arg0, %c0_i32 : i32, i32
  }
  func.func @transform_1(%arg0: i32) -> (i32, i32) {
    %c0_i32 = arith.constant 0 : i32
    %c0_i32_0 = arith.constant 0 : i32
    %c0_i32_1 = arith.constant 0 : i32
    return %c0_i32, %c0_i32_0 : i32, i32
  }
  func.func @transform_2(%arg0: i32) -> (i32, i32) {
    %c0_i32 = arith.constant 0 : i32
    %c0_i32_0 = arith.constant 0 : i32
    %c0_i32_1 = arith.constant 0 : i32
    return %c0_i32, %c0_i32_0 : i32, i32
  }
  func.func @transform_3(%arg0: i32) -> (i32, i32) {
    %c0_i32 = arith.constant 0 : i32
    %c0_i32_0 = arith.constant 0 : i32
    return %arg0, %c0_i32 : i32, i32
  }
}

</mosaic_0001>

<bundles_post_ra>
// kernel: _patchify_forward.1
= control target key start
LH: loop header
LB: loop body
LE: loop exit
PB: predicated region body
PF: predicated region fallthrough
CT: control target
= control target key end

     0   :  { %s454_s12 = smov 0   ;;  %s600_s0 = inlined_call_operand.vmem [shape: f32[32,192], index: 0, kind: input, shape index: {}]   ;;  %s601_s1 = inlined_call_operand.vmem [shape: f32[192,128], index: 1, kind: input, shape index: {}]   ;;  %s602_s2 = inlined_call_operand.vmem [shape: f32[1,128], index: 2, kind: input, shape index: {}]   ;;  %s603_s3 = inlined_call_operand.vmem [shape: f32[32,128], index: 3, kind: output, shape index: {}]  }
   0x1 LB: > { %s352_s13 = sadd.s32 4294967295, %s431_s12   ;;  %p356_p0 = scmp.ge.s32.totalorder %s431_s12, 1  ;;  %s431_s12 = sphi %s454_s12, %s13_s12  }
   0x2   : > { %p139_p1 = scmp.lt.s32.totalorder %s431_s12, 3 }
   0x4   : > { %p140_p2 = pnand %p356_p0, %p139_p1 }
   0x5   : > { %s357_s21 = sshll.u32 (!%p140_p2), %s352_s13, 1 }
   0x6   : > { %143 = sbr.rel (%p140_p2) target bundleno = 257 (0x101), region = 32  ;;  %p165_p3 = scmp.lt.s32.totalorder (!%p140_p2), %s357_s21, 3 }
   0xb   : > { %v196_v0 = vld [vmem:[%s601_s1 + $0x78] sm:$0xff]  ;;  %v433_v1 = vmov 0.0   ;;  %v195_v2 = vld [vmem:[%s601_s1 + $0x70] sm:$0xff]  ;;  %v194_v3 = vld [vmem:[%s601_s1 + $0x68] sm:$0xff]  ;;  %s605_s21 = smov (!%p165_p3, %s357_s21), 3  ;;  %vm212_vm0 = vcmask 523264  }
   0xc   : > { %219 = vmatprep.subr.mxu0 %v433_v1  ;;  %368 = vmatprep.subr.mxu1 %v433_v1  ;;  %v193_v4 = vld [vmem:[%s601_s1 + $0x60] sm:$0xff]  ;;  %v192_v5 = vld [vmem:[%s601_s1 + $0x58] sm:$0xff]  ;;  %v191_v6 = vld [vmem:[%s601_s1 + $0x50] sm:$0xff]  ;;  %s367_s4 = sshll.u32 %s605_s21, 4  ;;  %s361_s16 = sshll.u32 %s605_s21, 3 }
   0xd   : > { %220 = vmatpush1.msra.mxu0 %v196_v0  ;;  %392 = vmatpush1.msra.mxu1 %v196_v0  ;;  %v190_v7 = vld [vmem:[%s601_s1 + $0x48] sm:$0xff]  ;;  %v189_v8 = vld [vmem:[%s601_s1 + $0x40] sm:$0xff]  ;;  %v188_v9 = vld [vmem:[%s601_s1 + $0x38] sm:$0xff]  ;;  %s169_s11 = scalar_lea.vmem %s600_s0, %s367_s4  ;;  %s175_s22 = scalar_lea.vmem %s603_s3, %s361_s16 }
   0xe   : > { %221 = vmatprep.subr.mxu0 %v433_v1  ;;  %369 = vmatprep.subr.mxu1 %v433_v1  ;;  %v187_v10 = vld [vmem:[%s601_s1 + $0x30] sm:$0xff]  ;;  %v186_v11 = vld [vmem:[%s601_s1 + $0x28] sm:$0xff]  ;;  %v185_v12 = vld [vmem:[%s601_s1 + $0x20] sm:$0xff] }
   0xf   : > { %222 = vmatpush1.msra.mxu0 %v195_v2  ;;  %393 = vmatpush1.msra.mxu1 %v195_v2  ;;  %v184_v13 = vld [vmem:[%s601_s1 + $0x18] sm:$0xff]  ;;  %v183_v14 = vld [vmem:[%s601_s1 + $0x10] sm:$0xff]  ;;  %v182_v15 = vld [vmem:[%s601_s1 + $0x8] sm:$0xff] }
  0x10   : > { %223 = vmatprep.subr.mxu0 %v433_v1  ;;  %370 = vmatprep.subr.mxu1 %v433_v1  ;;  %v181_v16 = vld [vmem:[%s601_s1] sm:$0xff]  ;;  %v204_v17 = vld [vmem:[%s601_s1 + $0xb8] sm:$0xff]  ;;  %v203_v18 = vld [vmem:[%s601_s1 + $0xb0] sm:$0xff] }
  0x11   : > { %224 = vmatpush1.msra.mxu0 %v194_v3  ;;  %394 = vmatpush1.msra.mxu1 %v194_v3  ;;  %v202_v19 = vld [vmem:[%s601_s1 + $0xa8] sm:$0xff]  ;;  %v201_v20 = vld [vmem:[%s601_s1 + $0xa0] sm:$0xff]  ;;  %v200_v21 = vld [vmem:[%s601_s1 + $0x98] sm:$0xff] }
  0x12   : > { %225 = vmatprep.subr.mxu0 %v433_v1  ;;  %371 = vmatprep.subr.mxu1 %v433_v1  ;;  %v199_v22 = vld [vmem:[%s601_s1 + $0x90] sm:$0xff]  ;;  %v198_v23 = vld [vmem:[%s601_s1 + $0x88] sm:$0xff]  ;;  %v197_v24 = vld [vmem:[%s601_s1 + $0x80] sm:$0xff] }
  0x13   : > { %226 = vmatpush1.msra.mxu0 %v193_v4  ;;  %395 = vmatpush1.msra.mxu1 %v193_v4  ;;  %v178_v25 = vld [vmem:[%s169_s11 + $0x8] sm:$0xff]  ;;  %v180_v26 = vld [vmem:[%s169_s11 + $0x18] sm:$0xff]  ;;  %v177_v27 = vld [vmem:[%s169_s11] sm:$0xff] }
  0x14   : > { %227 = vmatprep.subr.mxu0 %v433_v1  ;;  %372 = vmatprep.subr.mxu1 %v433_v1  ;;  %v179_v28 = vld [vmem:[%s169_s11 + $0x10] sm:$0xff]  ;;  %v362_v29 = vld [vmem:[%s602_s2] ss:$0 sm:$0xff] }
  0x15   : > { %228 = vmatpush1.msra.mxu0 %v192_v5  ;;  %396 = vmatpush1.msra.mxu1 %v192_v5 }
  0x16   : > { %229 = vmatprep.subr.mxu0 %v433_v1  ;;  %373 = vmatprep.subr.mxu1 %v433_v1 }
  0x17   : > { %230 = vmatpush1.msra.mxu0 %v191_v6  ;;  %397 = vmatpush1.msra.mxu1 %v191_v6 }
  0x18   : > { %231 = vmatprep.subr.mxu0 %v433_v1  ;;  %374 = vmatprep.subr.mxu1 %v433_v1 }
  0x19   : > { %232 = vmatpush1.msra.mxu0 %v190_v7  ;;  %398 = vmatpush1.msra.mxu1 %v190_v7 }
  0x1a   : > { %233 = vmatprep.subr.mxu0 %v433_v1  ;;  %375 = vmatprep.subr.mxu1 %v433_v1 }
  0x1b   : > { %234 = vmatpush1.msra.mxu0 %v189_v8  ;;  %399 = vmatpush1.msra.mxu1 %v189_v8 }
  0x1c   : > { %235 = vmatprep.subr.mxu0 %v433_v1  ;;  %376 = vmatprep.subr.mxu1 %v433_v1 }
  0x1d   : > { %236 = vmatpush1.msra.mxu0 %v188_v9  ;;  %400 = vmatpush1.msra.mxu1 %v188_v9 }
  0x1e   : > { %237 = vmatprep.subr.mxu0 %v433_v1  ;;  %377 = vmatprep.subr.mxu1 %v433_v1 }
  0x1f   : > { %238 = vmatpush1.msra.mxu0 %v187_v10  ;;  %401 = vmatpush1.msra.mxu1 %v187_v10 }
  0x20   : > { %239 = vmatprep.subr.mxu0 %v433_v1  ;;  %378 = vmatprep.subr.mxu1 %v433_v1 }
  0x21   : > { %240 = vmatpush1.msra.mxu0 %v186_v11  ;;  %402 = vmatpush1.msra.mxu1 %v186_v11 }
  0x22   : > { %241 = vmatprep.subr.mxu0 %v433_v1  ;;  %379 = vmatprep.subr.mxu1 %v433_v1 }
  0x23   : > { %242 = vmatpush1.msra.mxu0 %v185_v12  ;;  %403 = vmatpush1.msra.mxu1 %v185_v12 }
  0x24   : > { %243 = vmatprep.subr.mxu0 %v433_v1  ;;  %380 = vmatprep.subr.mxu1 %v433_v1 }
  0x25   : > { %244 = vmatpush1.msra.mxu0 %v184_v13  ;;  %404 = vmatpush1.msra.mxu1 %v184_v13 }
  0x26   : > { %245 = vmatprep.subr.mxu0 %v433_v1  ;;  %381 = vmatprep.subr.mxu1 %v433_v1 }
  0x27   : > { %246 = vmatpush1.msra.mxu0 %v183_v14  ;;  %405 = vmatpush1.msra.mxu1 %v183_v14 }
  0x28   : > { %247 = vmatprep.subr.mxu0 %v433_v1  ;;  %382 = vmatprep.subr.mxu1 %v433_v1 }
  0x29   : > { %248 = vmatpush1.msra.mxu0 %v182_v15  ;;  %406 = vmatpush1.msra.mxu1 %v182_v15 }
  0x2a   : > { %249 = vmatprep.subr.mxu0 %v433_v1  ;;  %383 = vmatprep.subr.mxu1 %v433_v1 }
  0x2b   : > { %250 = vmatpush1.msra.mxu0 %v181_v16  ;;  %407 = vmatpush1.msra.mxu1 %v181_v16 }
  0x2c   : > { %267 = vmatprep.subr.mxu0 %v433_v1  ;;  %384 = vmatprep.subr.mxu1 %v433_v1 }
  0x2d   : > { %268 = vmatpush2.msra.mxu0 %v204_v17  ;;  %408 = vmatpush2.msra.mxu1 %v204_v17 }
  0x2e   : > { %269 = vmatprep.subr.mxu0 %v433_v1  ;;  %385 = vmatprep.subr.mxu1 %v433_v1 }
  0x2f   : > { %270 = vmatpush2.msra.mxu0 %v203_v18  ;;  %409 = vmatpush2.msra.mxu1 %v203_v18 }
  0x30   : > { %271 = vmatprep.subr.mxu0 %v433_v1  ;;  %386 = vmatprep.subr.mxu1 %v433_v1 }
  0x31   : > { %272 = vmatpush2.msra.mxu0 %v202_v19  ;;  %410 = vmatpush2.msra.mxu1 %v202_v19 }
  0x32   : > { %273 = vmatprep.subr.mxu0 %v433_v1  ;;  %387 = vmatprep.subr.mxu1 %v433_v1 }
  0x33   : > { %274 = vmatpush2.msra.mxu0 %v201_v20  ;;  %411 = vmatpush2.msra.mxu1 %v201_v20 }
  0x34   : > { %275 = vmatprep.subr.mxu0 %v433_v1  ;;  %388 = vmatprep.subr.mxu1 %v433_v1 }
  0x35   : > { %276 = vmatpush2.msra.mxu0 %v200_v21  ;;  %412 = vmatpush2.msra.mxu1 %v200_v21 }
  0x36   : > { %277 = vmatprep.subr.mxu0 %v433_v1  ;;  %389 = vmatprep.subr.mxu1 %v433_v1 }
  0x37   : > { %278 = vmatpush2.msra.mxu0 %v199_v22  ;;  %413 = vmatpush2.msra.mxu1 %v199_v22 }
  0x38   : > { %279 = vmatprep.subr.mxu0 %v433_v1  ;;  %390 = vmatprep.subr.mxu1 %v433_v1 }
  0x39   : > { %280 = vmatpush2.msra.mxu0 %v198_v23  ;;  %414 = vmatpush2.msra.mxu1 %v198_v23 }
  0x3a   : > { %281 = vmatprep.subr.mxu0 %v433_v1  ;;  %391 = vmatprep.subr.mxu1 %v433_v1 }
  0x3b   : > { %282 = vmatpush2.msra.mxu0 %v197_v24  ;;  %415 = vmatpush2.msra.mxu1 %v197_v24 }
  0x3c   : > { %363 = vmatprep.mubr.msk.f32.mxu0 %vm212_vm0, %v178_v25  ;;  %364 = vmatprep.mubr.msk.f32.mxu1 %vm212_vm0, %v180_v26 }
  0x3d   : > { %284 = vmatmul.mubr.f32.vlgmr.msra.gmra.mxu0 %v177_v27  ;;  %289 = vmatmul.mubr.f32.vlgmr.msra.gmra.mxu1 %v179_v28 }
  0xfd   : > { %v285_v30 = vpop.f32.mrf.mxu0  ;;  %v290_v31 = vpop.f32.mrf.mxu1 }
  0xfe   : > { %v286_v32 = vadd.f32 %v362_v29, %v285_v30  ;;  %v291_v33 = vadd.f32 %v362_v29, %v290_v31 }
  0xff   : > { %v287_v34 = vpop.f32.mrf.mxu0  ;;  %v292_v35 = vpop.f32.mrf.mxu1 }
 0x100   : > { %294 = vst [vmem:[%s175_s22] sm:$0xff] %v286_v32  ;;  %295 = vst [vmem:[%s175_s22 + $0x8] sm:$0xff] %v291_v33 }
 0x101 PF: > { %s13_s12 = sadd.s32 1, %s431_s12  }
 0x102   : > { %p10_p4 = scmp.ge.s32.totalorder %s13_s12, 4  }
 0x104   :  { %12 = sbr.rel (!%p10_p4) target bundleno = 1 (0x1), region = 62 }

</bundles_post_ra>
